<compile_context>
chip_gen: v7x
topology: tpu7x:2x2x1
jax: 0.10.0
libtpu: 0.0.40
codegen_flags: <defaults>
</compile_context>

<pallas_src>
import functools

import jax
import jax.numpy as jnp
import numpy as np
from jax.experimental import pallas as pl
from jax.experimental.pallas import tpu as pltpu


# ----------------------------------------------------------------------------
# Static helpers
# ----------------------------------------------------------------------------

def _sublane_multiple(dtype) -> int:
    """Sublane packing multiple: 8 for 4-byte, 16 for 2-byte, 32 for 1-byte."""
    itemsize = np.dtype(dtype).itemsize
    return 8 * max(1, 4 // max(1, itemsize))


def _tpu_defaults():
    """Per-generation byte budgets (double-buffered in+out footprint)."""
    try:
        kind = jax.devices()[0].device_kind.lower()
    except Exception:  # pragma: no cover - e.g. during AOT on CPU
        kind = ""
    if "v7" in kind:
        # 64 MiB VMEM / 2 TCs: cap the footprint, keep >= 4 grid steps so the
        # "parallel" batch axis gives both TensorCores work.
        return dict(budget=24 << 20, vmem_limit=32 << 20, min_tiles=4)
    if "v6" in kind:
        # 128 MiB VMEM, 1.4 TB/s HBM: big tiles, raise the scoped limit.
        return dict(budget=24 << 20, vmem_limit=64 << 20, min_tiles=1)
    if "v5" in kind:
        # ~820 GB/s HBM, 16 MiB default scoped VMEM: big tiles amortize the
        # ~0.35 us per-step overhead; explicit vmem_limit makes them legal.
        return dict(budget=16 << 20, vmem_limit=32 << 20, min_tiles=1)
    # Unknown generation: conservative.
    return dict(budget=8 << 20, vmem_limit=32 << 20, min_tiles=2)


def _choose_batch_tile(batch, f_total, dtype, *, budget_bytes, min_tiles,
                       requested=None) -> int:
    """Largest batch tile whose double-buffered in+out footprint fits budget."""
    sub = _sublane_multiple(dtype)
    itemsize = np.dtype(dtype).itemsize
    if requested is None:
        per_row = 4 * f_total * itemsize            # 2 bufs x (in + out)
        requested = max(sub, budget_bytes // max(1, per_row))
        if min_tiles > 1:                           # keep every core busy
            requested = min(requested, max(sub, pl.cdiv(batch, min_tiles)))
    requested = int(requested)
    if requested >= batch:
        return batch                                # single full-extent block
    return max(sub, (requested // sub) * sub)       # multiple of the sublane


def _output_permutation(irreps) -> np.ndarray:
    """perm such that out_flat[:, p] = x[:, perm[p]] for the (mul, d_total) view."""
    mul = irreps[0][0]
    perm = []
    for m_idx in range(mul):
        src_off = 0
        for m, d in irreps:
            base = src_off + m_idx * d
            perm.extend(range(base, base + d))
            src_off += m * d
    return np.asarray(perm, dtype=np.int32)


# ----------------------------------------------------------------------------
# Kernel bodies (preference order; all bitwise-identical results)
# ----------------------------------------------------------------------------

def _widen(x):
    """Lift sub-32-bit tiles to a 32-bit dtype for the lane gather (VPU-cheap)."""
    if np.dtype(x.dtype).itemsize >= 4:
        return x
    if jnp.issubdtype(x.dtype, jnp.floating):
        return x.astype(jnp.float32)
    return x.astype(jnp.int32)


def _gather_take_kernel(x_ref, o_ref, *, perm):
    # Primary path: one static column-permutation gather on the whole 2D tile,
    # then a single lane-dense full-width store.
    x = _widen(x_ref[...])
    idx = jnp.asarray(perm, dtype=jnp.int32)
    o_ref[...] = jnp.take(x, idx, axis=1).astype(o_ref.dtype)


def _gather_tala_kernel(x_ref, o_ref, *, perm):
    # Same gather expressed as take_along_axis (the dynamic_gather pattern
    # Mosaic matches most readily).
    x = _widen(x_ref[...])
    idx = jnp.broadcast_to(jnp.asarray(perm, dtype=jnp.int32)[None, :], x.shape)
    o_ref[...] = jnp.take_along_axis(x, idx, axis=1).astype(o_ref.dtype)


def _concat_kernel(x_ref, o_ref, *, irreps):
    # Fallback relayout (always lowers): per-irrep slice/reshape + concat.
    # Slower (narrow intermediates) but kept so the op never fails to compile.
    bt = x_ref.shape[0]
    x = x_ref[...]
    pieces, ix = [], 0
    for m, d in irreps:                      # static python loop, unrolled
        pieces.append(x[:, ix:ix + m * d].reshape(bt, m, d))
        ix += m * d
    o_ref[...] = jnp.concatenate(pieces, axis=-1).reshape(bt, -1)


# Cache which kernel variant lowers on the current jax/libtpu, per problem key.
_KERNEL_CHOICE = {}


# ----------------------------------------------------------------------------
# Wrapper
# ----------------------------------------------------------------------------

def reshape_irreps(x, irreps, *, batch_tile=None):
    """Pallas TPU equivalent of MACE's reshape_irreps.forward.

    x:      (batch, sum_i mul*d_i)
    irreps: sequence of (mul, d) pairs with equal mul
    returns (batch, mul, sum_i d_i)
    """
    irreps = tuple((int(m), int(d)) for m, d in irreps)
    muls = {m for m, _ in irreps}
    assert len(muls) == 1, "reshape_irreps requires equal multiplicities"
    mul = irreps[0][0]
    d_total = sum(d for _, d in irreps)
    f_total = sum(m * d for m, d in irreps)
    assert f_total == mul * d_total

    batch, feat = x.shape
    assert feat == f_total, f"expected {f_total} features, got {feat}"
    dtype = x.dtype
    itemsize = np.dtype(dtype).itemsize

    cfg = _tpu_defaults()
    bt = _choose_batch_tile(batch, f_total, dtype,
                            budget_bytes=cfg["budget"],
                            min_tiles=cfg["min_tiles"],
                            requested=batch_tile)
    sub = _sublane_multiple(dtype)
    assert bt == batch or bt % sub == 0
    num_tiles = pl.cdiv(batch, bt)          # partial last block handled by Pallas

    perm = _output_permutation(irreps)
    cost = pl.CostEstimate(flops=0, transcendentals=0,
                           bytes_accessed=2 * batch * f_total * itemsize)

    def build(kernel_body):
        return pl.pallas_call(
            kernel_body,
            out_shape=jax.ShapeDtypeStruct((batch, f_total), dtype),
            grid_spec=pl.GridSpec(
                grid=(num_tiles,),
                in_specs=[pl.BlockSpec((bt, f_total), lambda i: (i, 0))],
                out_specs=pl.BlockSpec((bt, f_total), lambda i: (i, 0)),
            ),
            compiler_params=pltpu.CompilerParams(
                dimension_semantics=("parallel",),   # megacore shards batch axis
                vmem_limit_bytes=cfg["vmem_limit"],
            ),
            cost_estimate=cost,
        )

    variants = (
        functools.partial(_gather_take_kernel, perm=perm),
        functools.partial(_gather_tala_kernel, perm=perm),
        functools.partial(_concat_kernel, irreps=irreps),
    )
    key = (irreps, str(np.dtype(dtype)))
    start = _KERNEL_CHOICE.get(key, 0)

    out2d, last_err = None, None
    for idx in range(start, len(variants)):
        try:
            out2d = jax.block_until_ready(build(variants[idx])(x))
            _KERNEL_CHOICE[key] = idx
            break
        except Exception as e:   # Mosaic may reject a gather form; fall through
            last_err = e
    if out2d is None:
        raise last_err

    # Free row-major view: (batch, mul*d_total) -> (batch, mul, d_total).
    return out2d.reshape(batch, mul, d_total)


def reference_reshape_irreps(x, irreps):
    """Pure numpy reference mirroring the PyTorch forward."""
    batch = x.shape[0]
    ix, out = 0, []
    for m, d in irreps:
        out.append(x[:, ix:ix + m * d].reshape(batch, m, d))
        ix += m * d
    return np.concatenate(out, axis=-1)


if __name__ == "__main__":
    key = jax.random.PRNGKey(0)
    k1, k2, k3, k4 = jax.random.split(key, 4)

    # Synthetic irreps: 4x0e + 4x1o + 4x2e  ->  mul=4, dims (1, 3, 5)
    irreps = [(4, 1), (4, 3), (4, 5)]
    f_total = sum(m * d for m, d in irreps)   # 36

    # Case 1: tiled batch (grid of 4 pipelined steps).
    x1 = jax.random.normal(k1, (32, f_total), dtype=jnp.float32)
    out1 = jax.block_until_ready(reshape_irreps(x1, irreps, batch_tile=8))
    np.testing.assert_allclose(np.asarray(out1),
                               reference_reshape_irreps(np.asarray(x1), irreps),
                               rtol=0, atol=0)

    # Case 2: ragged batch -> partial last block, no jnp.pad round-trip.
    x2 = jax.random.normal(k2, (20, f_total), dtype=jnp.float32)
    out2 = jax.block_until_ready(reshape_irreps(x2, irreps, batch_tile=8))
    np.testing.assert_allclose(np.asarray(out2),
                               reference_reshape_irreps(np.asarray(x2), irreps),
                               rtol=0, atol=0)

    # Case 3: bf16 input, output dtype derived from x, tile multiple of 16.
    x3 = jax.random.normal(k3, (32, f_total), dtype=jnp.float32).astype(jnp.bfloat16)
    out3 = jax.block_until_ready(reshape_irreps(x3, irreps, batch_tile=16))
    np.testing.assert_allclose(
        np.asarray(out3).astype(np.float32),
        reference_reshape_irreps(np.asarray(x3).astype(np.float32), irreps),
        rtol=0, atol=0)

    # Case 4: automatic byte-based tile sizing (per-generation budget).
    x4 = jax.random.normal(k4, (64, f_total), dtype=jnp.float32)
    out4 = jax.block_until_ready(reshape_irreps(x4, irreps))
    np.testing.assert_allclose(np.asarray(out4),
                               reference_reshape_irreps(np.asarray(x4), irreps),
                               rtol=0, atol=0)

    print("KERNEL_OK")
</pallas_src>

<mosaic_0001>
module attributes {stable_mosaic.version = 11 : i64} {
  func.func @_concat_kernel(%arg0: i32, %arg1: memref<8x36xf32, #tpu.memory_space<vmem>>, %arg2: memref<8x36xf32, #tpu.memory_space<vmem>>) attributes {dimension_semantics = [#tpu.dimension_semantics<parallel>], iteration_bounds = array<i64: 4>, scalar_prefetch = 0 : i64, scratch_operands = 0 : i64, tpu.core_type = #tpu.core_type<tc>, window_params = [{transform_indices = @transform_0, window_bounds = array<i64: 8, 36>}, {transform_indices = @transform_1, window_bounds = array<i64: 8, 36>}]} {
    %c0 = arith.constant 0 : index
    %c0_0 = arith.constant 0 : index
    %0 = vector.load %arg1[%c0, %c0_0] : memref<8x36xf32, #tpu.memory_space<vmem>>, vector<8x36xf32>
    %1 = vector.extract_strided_slice %0 {offsets = [0, 0], sizes = [8, 4], strides = [1, 1]} : vector<8x36xf32> to vector<8x4xf32>
    %2 = vector.shape_cast %1 : vector<8x4xf32> to vector<8x4x1xf32>
    %3 = vector.extract_strided_slice %0 {offsets = [0, 4], sizes = [8, 12], strides = [1, 1]} : vector<8x36xf32> to vector<8x12xf32>
    %4 = vector.shape_cast %3 : vector<8x12xf32> to vector<8x4x3xf32>
    %5 = vector.extract_strided_slice %0 {offsets = [0, 16], sizes = [8, 20], strides = [1, 1]} : vector<8x36xf32> to vector<8x20xf32>
    %6 = vector.shape_cast %5 : vector<8x20xf32> to vector<8x4x5xf32>
    %7 = tpu.concatenate %2, %4, %6 in 2 : vector<8x4x1xf32>, vector<8x4x3xf32>, vector<8x4x5xf32> -> vector<8x4x9xf32>
    %8 = vector.shape_cast %7 : vector<8x4x9xf32> to vector<8x36xf32>
    %c0_1 = arith.constant 0 : index
    %c0_2 = arith.constant 0 : index
    %9 = vector.load %arg2[%c0_1, %c0_2] : memref<8x36xf32, #tpu.memory_space<vmem>>, vector<8x36xf32>
    tpu.vector_store %arg2[%c0_1, %c0_2], %8 {strides = array<i32>} : memref<8x36xf32, #tpu.memory_space<vmem>>, vector<8x36xf32>,
    return
  }
  func.func @transform_0(%arg0: i32) -> (i32, i32) {
    %c0_i32 = arith.constant 0 : i32
    %c0_i32_0 = arith.constant 0 : i32
    return %arg0, %c0_i32 : i32, i32
  }
  func.func @transform_1(%arg0: i32) -> (i32, i32) {
    %c0_i32 = arith.constant 0 : i32
    %c0_i32_0 = arith.constant 0 : i32
    return %arg0, %c0_i32 : i32, i32
  }
}

</mosaic_0001>

<bundles_post_ra>
// kernel: tpu_custom_call.1
= control target key start
LH: loop header
LB: loop body
LE: loop exit
PB: predicated region body
PF: predicated region fallthrough
CT: control target
= control target key end

     0   :  { %6 = vsyncpa [#allocation3], 0  ;;  %s1023_s0 = inlined_call_operand.hbm [shape: f32[32,36], index: 0, kind: input, shape index: {}]   ;;  %s1024_s1 = inlined_call_operand.hbm [shape: f32[32,36], index: 1, kind: output, shape index: {}]  }
   0x1   :  { %8 = vsyncpa [#allocation3 + $0x1], 0 }
   0x2   :  { %9 = vsyncpa [#allocation4], 0 }
   0x3   :  { %11 = vsyncpa [#allocation4 + $0x1], 0  ;;  %s816_s6 = smov 0   ;;  %s818_s7 = smov 0  }
   0x4   :  { %s820_s8 = smov 0   ;;  %s822_s9 = smov 0  }
   0x5 LB: > { %s837_s10 = sadd.s32 4294967295, %s786_s9   ;;  %s616_s11 = sadd.s32 4294967294, %s786_s9   ;;  %s786_s9 = sphi %s822_s9, %s1038_s9   ;;  %s782_s8 = sphi %s820_s8, %s1037_s8   ;;  %s778_s7 = sphi %s818_s7, %s1036_s7   ;;  %s774_s6 = sphi %s816_s6, %s1035_s6  }
   0x6   : > { %s841_s12 = sadd.s32 1, %s786_s9   ;;  %s24_s13 = sadd.s32 1, %s782_s8 }
   0x7   : > { %s21_s14 = ssub.s32 %s786_s9, %s841_s12  ;;  %p31_p0 = scmp.ne.s32.totalorder %s782_s8, %s778_s7 }
   0x8   : > { %p22_p1 = scmp.eq.s32.totalorder %s21_s14, 0  ;;  %p32_p2 = scmp.eq.s32.totalorder %s786_s9, 0 }
   0x9   : > { %p37_p3 = scmp.ne.s32.totalorder %s778_s7, %s774_s6  ;;  %p38_p4 = scmp.eq.s32.totalorder %s837_s10, 0 }
   0xa   : > { %s853_s15 = scalar_select %p22_p1, %s782_s8, %s24_s13  }
   0xb   : > { %p855_p5 = por %p32_p2, %p31_p0  ;;  %p859_p6 = por %p38_p4, %p37_p3 }
   0xc   : > { %p61_p7 = scmp.eq.s32.totalorder %s837_s10, 3  ;;  %p67_p8 = scmp.eq.s32.totalorder %s616_s11, 3 }
   0xd   : > { %p640_p9 = scmp.lt.s32.totalorder %s786_s9, 4  ;;  %s87_s20 = sand.u32 1, %s782_s8  }
   0xe   : > { %p865_p10 = por %p61_p7, %p31_p0  ;;  %p869_p11 = por %p67_p8, %p37_p3 }
   0xf   : > { %s620_s21 = sshll.u32 %s786_s9, 7  ;;  %s619_s22 = sshll.u32 %s87_s20, 3 }
  0x10   : > { %s1028_s18 = scalar_select %p865_p10, 1, 0 }
  0x11   : > { %s1029_s19 = scalar_select %p869_p11, 1, 0 }
  0x12   : > { %s878_s25 = scalar_lea.hbm %s1023_s0, %s620_s21  ;;  %s91_s26 = scalar_lea.vmem [#allocation2], %s619_s22 }
  0x13   : > { %s98_s27 = sshll.u32 %s91_s26, 4  ;;  %p882_p12 = pnand %p640_p9, %p855_p5  ;;  %s886_s27 = int_to_ptr.vmem [resolvable:$true] %s98_s27 }
  0x14   : > { %s88_s29 = scalar_lea.sflag [#allocation3], %s87_s20  ;;  %s690_s30 = scalar_lea.hbm %s878_s25, 128 }
  0x15   : > { %p691_p1 = scmp.ne.s32.totalorder %s878_s25, %s690_s30  ;;  %p692_p2 = pneg %p882_p12 }
  0x16   : > { %s695_s4 = scalar_lea.hbm %s1023_s0, 512  ;;  %p696_p5 = scmp.lt.u32.totalorder %s878_s25, %s1023_s0 }
  0x17   : > { %p693_p3 = pnand %p692_p2, %p691_p1  ;;  %p697_p7 = scmp.lt.u32.totalorder %s695_s4, %s690_s30 }
  0x18   : > { %p699_p9 = scmp.lt.u32.totalorder %s690_s30, %s878_s25 }
  0x19   : > { %p694_p4 = pneg %p693_p3  ;;  %p698_p8 = por %p697_p7, %p696_p5 }
  0x1b   : > { %p700_p13 = por %p699_p9, %p698_p8 }
  0x1d   : > { %p701_p0 = pnand %p700_p13, %p694_p4 }
  0x1f   : > { %704 = shalt.err (!%p701_p0)
}
  0x20   : > { %s705_s13 = scalar_lea.vmem %s886_s27, 128  ;;  %s788_s14 = smov [#allocation2]  }
  0x21   : > { %p706_p1 = scmp.ne.s32.totalorder %s886_s27, %s705_s13  ;;  %s710_s16 = sshll.u32 %s788_s14, 4  ;;  %s711_s16 = int_to_ptr.vmem [resolvable:$false] %s710_s16 }
  0x22   : > { %s712_s20 = scalar_lea.vmem %s711_s16, 256  ;;  %p713_p10 = scmp.lt.s32.totalorder %s886_s27, %s711_s16 }
  0x23   : > { %p708_p3 = pnand %p706_p1, %p692_p2  ;;  %p714_p5 = scmp.lt.s32.totalorder %s712_s20, %s705_s13 }
  0x25   : > { %p709_p11 = pneg %p708_p3  ;;  %p715_p7 = por %p714_p5, %p713_p10 }
  0x27   : > { %p716_p8 = pnand %p715_p7, %p709_p11 }
  0x29   : > { %719 = shalt.err (!%p716_p8)
}
  0x2a   : > { %635 = dma.hbm_to_vmem [thread:$0]  (!%p882_p12), %s878_s25, 128, %s886_s27, %s88_s29  }
  0x2b   : > { %p1031_p13 = scmp.lt.s32.totalorder %s786_s9, 5  ;;  %p1032_p0 = scmp.ge.s32.totalorder %s786_s9, 1 }
  0x2d   : > { %p104_p2 = pnand %p1032_p0, %p1031_p13 }
  0x2e   : > { %s920_s21 = sand.u32 (!%p104_p2), 1, %s778_s7  }
  0x2f   : > { %107 = sbr.rel (%p104_p2) target bundleno = 588 (0x24c), region = 24  ;;  %s622_s22 = sshll.u32 (!%p104_p2), %s920_s21, 3 }
  0x30   : > { %s110_s23 = scalar_lea.sflag (!%p104_p2), [#allocation3], %s920_s21  ;;  %s113_s24 = scalar_lea.vmem (!%p104_p2), [#allocation2], %s622_s22 }
  0x36   : > { %765 = dma.done.wait (%p859_p6), %s110_s23, 128  }
  0x37   : > { %767 = vsyncadd (%p859_p6), %s110_s23, 4294967168  ;;  %v132_v0 = vld [vmem:[%s113_s24] sm:$0xff]  ;;  %s789_s25 = smov 125   ;;  %s790_s26 = smov 119   ;;  %v133_v1 = vlaneseq  ;;  %v797_v26 = vmov 1983009808  }
  0x38   : > { %190 = vrot.lane.b32.xlu0 %v132_v0, %s789_s25  ;;  %194 = vrot.lane.b32.xlu1 %v132_v0, %s790_s26  ;;  %s791_s27 = smov 122   ;;  %s792_s28 = smov 123   ;;  %v211_v27 = vunpack.c.l.s4 %v797_v26  ;;  %v798_v30 = vmov 1934713408   ;;  %v800_v54 = vmov 0.0   ;;  %vm426_vm0 = vcmask 7168  }
  0x39   : > { %s793_s29 = smov 118   ;;  %s794_s30 = smov 113   ;;  %v134_v4 = vshrl.u32 %v133_v1, 7  ;;  %v243_v31 = vunpack.c.l.s4 %v798_v30  ;;  %vm435_vm1 = vcmask 31744   ;;  %vm524_vm2 = vcmask 72704  }
  0x3a   : > { %s795_s2 = smov 124   ;;  %s796_s3 = smov 112   ;;  %v212_v29 = vunpack.c.0.s8 %v211_v27  ;;  %vm526_vm3 = vcmask 146432   ;;  %vm528_vm4 = vcmask 220160   ;;  %vm530_vm5 = vcmask 293888  }
  0x3b   : > { %v135_v7 = vsub.s32 0, %v134_v4  ;;  %v142_v10 = vsub.s32 1, %v134_v4  ;;  %v149_v11 = vsub.s32 2, %v134_v4  ;;  %v156_v15 = vsub.s32 3, %v134_v4  ;;  %s799_s17 = smov 1   ;;  %s801_s4 = smov 4  }
  0x3c   : > { %192 = vrot.lane.b32.xlu0 %v132_v0, %s791_s27  ;;  %276 = vrot.lane.b32.xlu1 %v132_v0, %s792_s28  ;;  %v163_v16 = vsub.s32 4, %v134_v4  ;;  %v170_v19 = vsub.s32 5, %v134_v4  ;;  %v177_v20 = vsub.s32 6, %v134_v4  ;;  %v184_v23 = vsub.s32 7, %v134_v4  ;;  %s802_s5 = smov 18   ;;  %s803_s11 = smov 9  }
  0x3d   : > { %v136_v9 = vrot.slane %v132_v0, %v135_v7  ;;  %v143_v13 = vrot.slane %v132_v0, %v142_v10  ;;  %v150_v14 = vrot.slane %v132_v0, %v149_v11  ;;  %v157_v17 = vrot.slane %v132_v0, %v156_v15  ;;  %s804_s13 = smov 27   ;;  %s625_s14 = sshll.u32 %s837_s10, 7 }
  0x3e   : > { %v164_v18 = vrot.slane %v132_v0, %v163_v16  ;;  %v171_v21 = vrot.slane %v132_v0, %v170_v19  ;;  %v178_v22 = vrot.slane %v132_v0, %v177_v20  ;;  %v185_v24 = vrot.slane %v132_v0, %v184_v23  ;;  %s131_s16 = scalar_lea.vmem [#allocation5], %s622_s22  ;;  %s980_s25 = scalar_lea.hbm %s1024_s1, %s625_s14 }
  0x3f   : > { %v930_v33 = vsub.s32 %v212_v29, %v134_v4  ;;  %v244_v34 = vunpack.c.0.s8 %v243_v31  ;;  %s546_s20 = sshll.u32 %s131_s16, 4  ;;  %s533_s10 = scalar_lea.sflag [#allocation4], %s920_s21  ;;  %s982_s20 = int_to_ptr.vmem [resolvable:$true] %s546_s20 }
  0x40   : > { %278 = vrot.lane.b32.xlu0 %v132_v0, %s793_s29  ;;  %280 = vrot.lane.b32.xlu1 %v132_v0, %s794_s30  ;;  %s720_s26 = scalar_lea.vmem %s982_s20, 128  ;;  %p1033_p10 = scmp.ne.s32.totalorder %s1028_s18, 0 }
  0x41   : > { %v934_v43 = vsub.s32 %v244_v34, %v134_v4  ;;  %p721_p6 = scmp.ne.s32.totalorder %s982_s20, %s720_s26  ;;  %s805_s22 = smov [#allocation5]  }
  0x42   : > { %s724_s27 = sshll.u32 %s805_s22, 4  ;;  %s725_s27 = int_to_ptr.vmem [resolvable:$false] %s724_s27 }
  0x43   : > { %p722_p11 = pnand %p721_p6, %p1033_p10  ;;  %s726_s28 = scalar_lea.vmem %s725_s27, 256 }
  0x44   : > { %196 = vrot.lane.b32.xlu0 %v132_v0, %s795_s2  ;;  %p727_p4 = scmp.lt.s32.totalorder %s982_s20, %s725_s27  ;;  %p728_p9 = scmp.lt.s32.totalorder %s726_s28, %s720_s26 }
  0x45   : > { %p723_p12 = pneg %p722_p11 }
  0x46   : > { %p729_p1 = por %p728_p9, %p727_p4 }
  0x48   : > { %282 = vrot.lane.b32.xlu0 %v132_v0, %s796_s3  ;;  %p730_p3 = pnand %p729_p1, %p723_p12 }
  0xaa   : > { %v191_v2 = vpop.permute.xlu0 %190  ;;  %v195_v3 = vpop.permute.xlu1 %194 }
  0xab   : > { %198 = vrot.lane.b32.xlu1 %v191_v2, %s795_s2 }
  0xae   : > { %v193_v5 = vpop.permute.xlu0 %192  ;;  %v277_v6 = vpop.permute.xlu1 %276 }
  0xaf   : > { %202 = vrot.lane.b32.xlu1 %v195_v3, %s795_s2  ;;  %200 = vrot.lane.b32.xlu0 %v193_v5, %s795_s2 }
  0xb2   : > { %v279_v8 = vpop.permute.xlu0 %278  ;;  %v281_v12 = vpop.permute.xlu1 %280 }
  0xb3   : > { %284 = vrot.lane.b32.xlu1 %v277_v6, %s796_s3  ;;  %286 = vrot.lane.b32.xlu0 %v279_v8, %s796_s3 }
  0xb6   : > { %v197_v25 = vpop.permute.xlu0 %196 }
  0xb7   : > { %288 = vrot.lane.b32.xlu1 %v281_v12, %s796_s3  ;;  %138 = vbcast.lane.b32.xlu0 %v136_v9, 256 }
  0xba   : > { %v283_v28 = vpop.permute.xlu0 %282 }
  0xbb   : > { %145 = vbcast.lane.b32.xlu1 %v143_v13, 256  ;;  %152 = vbcast.lane.b32.xlu0 %v150_v14, 256 }
  0xbf   : > { %159 = vbcast.lane.b32.xlu1 %v157_v17, 256  ;;  %166 = vbcast.lane.b32.xlu0 %v164_v18, 256 }
  0xc3   : > { %173 = vbcast.lane.b32.xlu1 %v171_v21, 256  ;;  %180 = vbcast.lane.b32.xlu0 %v178_v22, 256 }
  0xc7   : > { %187 = vbcast.lane.b32.xlu1 %v185_v24, 256 }
 0x11d   : > { %v199_v32 = vpop.permute.xlu1 %198 }
 0x121   : > { %v203_v35 = vpop.permute.xlu1 %202  ;;  %v201_v36 = vpop.permute.xlu0 %200 }
 0x122   : > { %v224_v37 = vcombine.low %v199_v32, %v203_v35  ;;  %v225_v38 = vcombine.high %v199_v32, %v203_v35  ;;  %v208_v39 = vcombine.low %v197_v25, %v201_v36  ;;  %v209_v40 = vcombine.high %v197_v25, %v201_v36 }
 0x124   : > { %v232_v41 = vrot.slane %v224_v37, %v930_v33  ;;  %v216_v42 = vrot.slane %v208_v39, %v930_v33  ;;  %v239_v45 = vrot.slane %v225_v38, %v930_v33  ;;  %v223_v46 = vrot.slane %v209_v40, %v930_v33 }
 0x125   : > { %v285_v44 = vpop.permute.xlu1 %284  ;;  %v287_v50 = vpop.permute.xlu0 %286 }
 0x126   : > { %v240_v47 = vcombine.low %v216_v42, %v232_v41  ;;  %v241_v48 = vcombine.high %v216_v42, %v232_v41  ;;  %v256_v52 = vcombine.low %v223_v46, %v239_v45  ;;  %v294_v57 = vcombine.low %v283_v28, %v287_v50 }
 0x127   : > { %v257_v58 = vcombine.high %v223_v46, %v239_v45  ;;  %v295_v3 = vcombine.high %v283_v28, %v287_v50 }
 0x128   : > { %v248_v49 = vrot.slane %v240_v47, %v934_v43  ;;  %v255_v56 = vrot.slane %v241_v48, %v934_v43  ;;  %v264_v61 = vrot.slane %v256_v52, %v934_v43  ;;  %v302_v62 = vrot.slane %v294_v57, %v930_v33 }
 0x129   : > { %v289_v51 = vpop.permute.xlu1 %288  ;;  %v271_v2 = vrot.slane %v257_v58, %v934_v43  ;;  %v309_v8 = vrot.slane %v295_v3, %v930_v33  ;;  %v139_v18 = vpop.permute.xlu0 %138 }
 0x12a   : > { %v310_v53 = vcombine.low %v285_v44, %v289_v51  ;;  %370 = vrot.lane.b32.xlu0 %v248_v49, %s799_s17  ;;  %v272_v55 = vcombine.high %v248_v49, %v800_v54  ;;  %v273_v60 = vcombine.high %v255_v56, %v800_v54  ;;  %v311_v63 = vcombine.high %v285_v44, %v289_v51 }
 0x12b   : > { %v274_v1 = vcombine.high %v264_v61, %v800_v54  ;;  %v275_v6 = vcombine.high %v271_v2, %v800_v54 }
 0x12c   : > { %372 = vrot.lane.b32.xlu1 %v272_v55, %s799_s17  ;;  %v318_v59 = vrot.slane %v310_v53, %v930_v33  ;;  %v325_v4 = vrot.slane %v311_v63, %v930_v33 }
 0x12d   : > { %v146_v19 = vpop.permute.xlu1 %145  ;;  %v153_v20 = vpop.permute.xlu0 %152 }
 0x12e   : > { %374 = vrot.lane.b32.xlu0 %v255_v56, %s799_s17  ;;  %v326_v0 = vcombine.low %v302_v62, %v318_v59  ;;  %v327_v5 = vcombine.high %v302_v62, %v318_v59  ;;  %v342_v9 = vcombine.low %v309_v8, %v325_v4  ;;  %v343_v12 = vcombine.high %v309_v8, %v325_v4 }
 0x130   : > { %376 = vrot.lane.b32.xlu1 %v273_v60, %s799_s17  ;;  %v334_v7 = vrot.slane %v326_v0, %v934_v43  ;;  %v341_v11 = vrot.slane %v327_v5, %v934_v43  ;;  %v350_v14 = vrot.slane %v342_v9, %v934_v43  ;;  %v357_v16 = vrot.slane %v343_v12, %v934_v43 }
 0x131   : > { %v160_v21 = vpop.permute.xlu1 %159  ;;  %v167_v22 = vpop.permute.xlu0 %166 }
 0x132   : > { %378 = vrot.lane.b32.xlu0 %v264_v61, %s799_s17  ;;  %v358_v10 = vcombine.high %v334_v7, %v800_v54  ;;  %v359_v13 = vcombine.high %v341_v11, %v800_v54  ;;  %v360_v15 = vcombine.high %v350_v14, %v800_v54  ;;  %v361_v17 = vcombine.high %v357_v16, %v800_v54 }
 0x134   : > { %380 = vrot.lane.b32.xlu1 %v274_v1, %s799_s17 }
 0x135   : > { %v174_v23 = vpop.permute.xlu1 %173  ;;  %v181_v24 = vpop.permute.xlu0 %180 }
 0x136   : > { %382 = vrot.lane.b32.xlu0 %v271_v2, %s799_s17 }
 0x138   : > { %384 = vrot.lane.b32.xlu1 %v275_v6, %s799_s17 }
 0x139   : > { %v188_v25 = vpop.permute.xlu1 %187 }
 0x13a   : > { %402 = vrot.lane.b32.xlu0 %v334_v7, %s801_s4 }
 0x13c   : > { %404 = vrot.lane.b32.xlu1 %v358_v10, %s801_s4 }
 0x13e   : > { %406 = vrot.lane.b32.xlu0 %v341_v11, %s801_s4 }
 0x140   : > { %408 = vrot.lane.b32.xlu1 %v359_v13, %s801_s4 }
 0x142   : > { %410 = vrot.lane.b32.xlu0 %v350_v14, %s801_s4 }
 0x144   : > { %412 = vrot.lane.b32.xlu1 %v360_v15, %s801_s4 }
 0x146   : > { %414 = vrot.lane.b32.xlu0 %v357_v16, %s801_s4 }
 0x148   : > { %416 = vrot.lane.b32.xlu1 %v361_v17, %s801_s4 }
 0x19c   : > { %v371_v26 = vpop.permute.xlu0 %370 }
 0x19d   : > { %v427_v47 = vsel %vm426_vm0, %v139_v18, %v371_v26 }
 0x19e   : > { %v373_v27 = vpop.permute.xlu1 %372 }
 0x19f   : > { %v428_v41 = vsel %vm426_vm0, %v146_v19, %v373_v27 }
 0x1a0   : > { %v375_v28 = vpop.permute.xlu0 %374 }
 0x1a1   : > { %v429_v42 = vsel %vm426_vm0, %v153_v20, %v375_v28 }
 0x1a2   : > { %v377_v29 = vpop.permute.xlu1 %376 }
 0x1a3   : > { %v430_v38 = vsel %vm426_vm0, %v160_v21, %v377_v29 }
 0x1a4   : > { %v379_v30 = vpop.permute.xlu0 %378 }
 0x1a5   : > { %v431_v51 = vsel %vm426_vm0, %v167_v22, %v379_v30 }
 0x1a6   : > { %v381_v31 = vpop.permute.xlu1 %380 }
 0x1a7   : > { %v432_v57 = vsel %vm426_vm0, %v174_v23, %v381_v31 }
 0x1a8   : > { %v383_v32 = vpop.permute.xlu0 %382 }
 0x1a9   : > { %v433_v52 = vsel %vm426_vm0, %v181_v24, %v383_v32 }
 0x1aa   : > { %v385_v34 = vpop.permute.xlu1 %384 }
 0x1ab   : > { %v434_v58 = vsel %vm426_vm0, %v188_v25, %v385_v34 }
 0x1ac   : > { %v403_v35 = vpop.permute.xlu0 %402 }
 0x1ad   : > { %v436_v50 = vsel %vm435_vm1, %v427_v47, %v403_v35 }
 0x1ae   : > { %v405_v36 = vpop.permute.xlu1 %404 }
 0x1af   : > { %v437_v45 = vsel %vm435_vm1, %v428_v41, %v405_v36 }
 0x1b0   : > { %v407_v37 = vpop.permute.xlu0 %406 }
 0x1b1   : > { %v438_v46 = vsel %vm435_vm1, %v429_v42, %v407_v37 }
 0x1b2   : > { %v409_v39 = vpop.permute.xlu1 %408  ;;  %v444_v53 = vcombine.low %v436_v50, %v438_v46 }
 0x1b3   : > { %v439_v40 = vsel %vm435_vm1, %v430_v38, %v409_v39 }
 0x1b4   : > { %v411_v44 = vpop.permute.xlu0 %410  ;;  %v452_v48 = vcombine.low %v437_v45, %v439_v40  ;;  %v451_v0 = vrot.slane %v444_v53, %v930_v33 }
 0x1b5   : > { %v440_v55 = vsel %vm435_vm1, %v431_v51, %v411_v44 }
 0x1b6   : > { %v413_v49 = vpop.permute.xlu1 %412  ;;  %v459_v59 = vrot.slane %v452_v48, %v930_v33 }
 0x1b7   : > { %v441_v62 = vsel %vm435_vm1, %v432_v57, %v413_v49 }
 0x1b8   : > { %v415_v54 = vpop.permute.xlu0 %414  ;;  %v476_v2 = vcombine.low %v451_v0, %v459_v59  ;;  %v477_v3 = vcombine.high %v451_v0, %v459_v59 }
 0x1b9   : > { %v442_v56 = vsel %vm435_vm1, %v433_v52, %v415_v54 }
 0x1ba   : > { %v460_v60 = vcombine.low %v440_v55, %v442_v56  ;;  %v417_v61 = vpop.permute.xlu1 %416  ;;  %v491_v8 = vrot.slane %v477_v3, %v934_v43  ;;  %v484_v10 = vrot.slane %v476_v2, %v934_v43 }
 0x1bb   : > { %v443_v63 = vsel %vm435_vm1, %v434_v58, %v417_v61 }
 0x1bc   : > { %v468_v1 = vcombine.low %v441_v62, %v443_v63  ;;  %v467_v4 = vrot.slane %v460_v60, %v930_v33 }
 0x1be   : > { %v475_v5 = vrot.slane %v468_v1, %v930_v33 }
 0x1c0   : > { %v492_v6 = vcombine.low %v467_v4, %v475_v5  ;;  %v493_v7 = vcombine.high %v467_v4, %v475_v5 }
 0x1c2   : > { %v507_v9 = vrot.slane %v493_v7, %v934_v43  ;;  %v500_v11 = vrot.slane %v492_v6, %v934_v43 }
 0x1c4   : > { %v510_v12 = vcombine.low %v491_v8, %v507_v9  ;;  %v509_v13 = vcombine.high %v484_v10, %v500_v11  ;;  %v508_v14 = vcombine.low %v484_v10, %v500_v11  ;;  %v511_v33 = vcombine.high %v491_v8, %v507_v9 }
 0x1c6   : > { %517 = vrot.lane.b32.xlu1 %v510_v12, %s802_s5  ;;  %513 = vrot.lane.b32.xlu0 %v509_v13, %s803_s11 }
 0x1ca   : > { %521 = vrot.lane.b32.xlu0 %v511_v33, %s804_s13 }
 0x238   : > { %v514_v15 = vpop.permute.xlu0 %513  ;;  %v518_v16 = vpop.permute.xlu1 %517 }
 0x239   : > { %v525_v17 = vsel %vm524_vm2, %v508_v14, %v514_v15 }
 0x23a   : > { %v527_v18 = vsel %vm526_vm3, %v525_v17, %v518_v16 }
 0x23c   : > { %v522_v43 = vpop.permute.xlu0 %521 }
 0x23d   : > { %v529_v19 = vsel %vm528_vm4, %v527_v18, %v522_v43 }
 0x23e   : > { %531 = vst.msk [vmem:[%s131_s16] sm:$0xff] %vm530_vm5, %v529_v19 }
 0x23f   : > { %733 = shalt.err (!%p730_p3)
}
 0x240   : > { %s734_s21 = scalar_lea.hbm %s980_s25, 128  ;;  %s738_s2 = scalar_lea.hbm %s1024_s1, 512 }
 0x241   : > { %p735_p5 = scmp.ne.s32.totalorder %s980_s25, %s734_s21  ;;  %p739_p13 = scmp.lt.u32.totalorder %s980_s25, %s1024_s1 }
 0x242   : > { %p740_p0 = scmp.lt.u32.totalorder %s738_s2, %s734_s21  ;;  %p742_p6 = scmp.lt.u32.totalorder %s734_s21, %s980_s25 }
 0x243   : > { %p736_p7 = pnand %p735_p5, %p1033_p10 }
 0x244   : > { %p741_p2 = por %p740_p0, %p739_p13 }
 0x245   : > { %p737_p8 = pneg %p736_p7 }
 0x246   : > { %p743_p11 = por %p742_p6, %p741_p2 }
 0x248   : > { %p744_p12 = pnand %p743_p11, %p737_p8 }
 0x24a   : > { %747 = shalt.err (!%p744_p12)
}
 0x24b   : > { %630 = dma.vmem_to_hbm [thread:$0]  (%p1033_p10), %s982_s20, 128, %s980_s25, %s533_s10  }
 0x24c PF: > { %p641_p4 = scmp.ge.s32.totalorder %s786_s9, 2  ;;  %s558_s4 = sand.u32 1, %s774_s6  }
 0x24d   : > { %p1034_p9 = scmp.ne.s32.totalorder %s1029_s19, 0  ;;  %s559_s5 = scalar_lea.sflag [#allocation4], %s558_s4 }
 0x24f   : > { %p637_p1 = pnand %p641_p4, %p1034_p9 }
 0x251   : > { %769 = dma.done.wait (!%p637_p1), %s559_s5, 128  }
 0x252   : > { %771 = vsyncadd (!%p637_p1), %s559_s5, 4294967168  ;;  %p14_p3 = scmp.ge.s32.totalorder %s841_s12, 6   ;;  %s1035_s6 = smov %s778_s7 }
 0x253   : > { %s1036_s7 = smov %s782_s8  ;;  %s1037_s8 = smov %s853_s15 }
 0x254   : > { %s1038_s9 = smov %s841_s12  ;;  %16 = sbr.rel (!%p14_p3) target bundleno = 5 (0x5), region = 69 }
 0x25b   :  { %564 = vsyncpa [#allocation3], 1 }
 0x25c   :  { %566 = vsyncpa [#allocation3 + $0x1], 1 }
 0x25d   :  { %567 = vsyncpa [#allocation4], 1 }
 0x25e   :  { %569 = vsyncpa [#allocation4 + $0x1], 1 }

</bundles_post_ra>
